<compile_context>
chip_gen: v6e
topology: v6e:2x2x1
jax: 0.10.0
libtpu: 0.0.40
codegen_flags: <defaults>
</compile_context>

<pallas_src>
import functools

import jax
import jax.numpy as jnp
import numpy as np
from jax.experimental import pallas as pl
from jax.experimental.pallas import tpu as pltpu

_LOG_SCALES_MIN = -7.0


def _recip(d):
    # 1/d with one EUP vrcp + two Newton-Raphson refinements (VPU only).
    # d is in [1, 2] here, so the refined result is accurate to ~f32 precision
    # while keeping the saturated EUP slot cheap (no divide sequence).
    r = pl.reciprocal(d, approx=True)
    r = r * (2.0 - d * r)
    r = r * (2.0 - d * r)
    return r


def dmll_kernel(x_ref, l_ref, out_ref, *, bin_width, x_lower, x_upper, t):
    # x_ref: (S8, LS)   l_ref: (num_p, K, S8, LS)   out_ref: (S8, LS)
    x = x_ref[...].astype(jnp.float32)
    is_upper = (x > x_upper)[None]          # hoisted, computed once per tile
    is_lower = (x < x_lower)[None]
    xk = x[None]                            # broadcast over mixtures

    logit_pis = l_ref[0].astype(jnp.float32)            # (K, S8, LS)
    means = l_ref[1].astype(jnp.float32)
    if t != 1.0:
        means = means * t
    log_scales = jnp.maximum(l_ref[2].astype(jnp.float32), _LOG_SCALES_MIN)

    inv_stdv = jnp.exp(-log_scales)
    centered_x = jnp.abs(xk - means)
    half_bin = bin_width * 0.5
    plus_in = inv_stdv * (half_bin - centered_x)
    min_in = inv_stdv * (-half_bin - centered_x)        # always <= 0

    # --- plus side: softplus + sigmoid sharing a single exp ---
    e_p = jnp.exp(-jnp.abs(plus_in))                    # in (0, 1]
    sp_plus = jnp.maximum(plus_in, 0.0) + jnp.log1p(e_p)
    log_cdf_plus = plus_in - sp_plus                    # log sigmoid(plus_in)
    r_p = _recip(1.0 + e_p)
    cdf_plus = jnp.where(plus_in >= 0.0, r_p, e_p * r_p)   # sigmoid(plus_in)

    # --- min side: min_in <= 0, so exp(min_in) is the softplus exp too ---
    e_m = jnp.exp(min_in)                               # in (0, 1]
    sp_min = jnp.log1p(e_m)                             # softplus(min_in)
    log_one_minus_cdf_min = -sp_min
    cdf_min = e_m * _recip(1.0 + e_m)                   # sigmoid(min_in)

    out_A = jnp.log(jnp.maximum(cdf_plus - cdf_min, 1e-12))
    out_B = jnp.where(is_upper, log_one_minus_cdf_min, out_A)
    log_probs = jnp.where(is_lower, log_cdf_plus, out_B)

    # Fused reduction over the (major) mixture axis:
    #   -lse(log_probs + log_softmax(pi)) = lse(pi) - lse(pi + log_probs)
    lw = logit_pis + log_probs
    m_lw = jnp.max(lw, axis=0)
    lse_lw = m_lw + jnp.log(jnp.sum(jnp.exp(lw - m_lw[None]), axis=0))
    m_pi = jnp.max(logit_pis, axis=0)
    lse_pi = m_pi + jnp.log(jnp.sum(jnp.exp(logit_pis - m_pi[None]), axis=0))

    out_ref[...] = (lse_pi - lse_lw).astype(out_ref.dtype)


def dmll_forward(x, l, *, num_p=3, x_min=0.0, x_max=255.0, L=256, t=1.0):
    """JAX/Pallas equivalent of DiscretizedMixDistribution.forward.

    x: (N, C, H, W) float targets in [x_min, x_max]
    l: (N, Kp, H, W) float (f32 or bf16), Kp = num_p * C * K
    returns: (N, C, H, W) float32 negative log-likelihoods (non-shared pis)
    """
    N, C, H, W = x.shape
    Kp = l.shape[1]
    K = Kp // (num_p * C)
    assert num_p >= 3, "only the num_p>=3 (non-shared pis) path is implemented"
    if not jnp.issubdtype(x.dtype, jnp.floating):
        x = x.astype(jnp.float32)
    if not jnp.issubdtype(l.dtype, jnp.floating):
        l = l.astype(jnp.float32)

    HW = H * W
    bin_width = (x_max - x_min) / (L - 1)
    x_lower = x_min + 0.001
    x_upper = x_max - 0.001

    # Lane-dense spatial layout: rows of 128 lanes, padded to a multiple of 8
    # rows so every vreg's sublanes are used (pad <= 1023 elements per slab).
    LS = 128
    SB = pl.cdiv(HW, LS)
    SB8 = ((SB + 7) // 8) * 8
    HW8 = SB8 * LS

    # Tile rows: budget double-buffered I/O blocks PLUS the live (K,S8,LS)
    # f32 intermediates the kernel creates (~8 of them), against a ~12 MiB
    # target (safe vs 32 MiB scoped VMEM on v6e/v7x, raised from 16 on v5e).
    per_row_io = 4 * LS * (num_p * K + 2)        # l params + x + out (f32)
    per_row_tmp = 4 * LS * (8 * K)               # conservative live temps
    per_row = 2 * per_row_io + per_row_tmp
    vmem_target = 12 * 1024 * 1024
    s8_cap = max(8, (vmem_target // per_row) // 8 * 8)
    S8 = min(s8_cap, SB8)
    # Prefer a tile that divides SB8 exactly (no ragged last block) if one
    # exists near the cap; otherwise accept a ragged last block via cdiv.
    for cand in range(S8, max(8, S8 // 2) - 1, -8):
        if SB8 % cand == 0:
            S8 = cand
            break
    num_s = pl.cdiv(SB8, S8)

    # v7x megacore: make sure there are at least 2 parallel grid steps.
    if N * C * num_s < 2 and S8 > 8:
        S8 = max(8, ((S8 // 2 + 7) // 8) * 8)
        num_s = pl.cdiv(SB8, S8)

    # Free contiguous reshape; pad the spatial axis only when HW % 1024 != 0.
    xf = x.reshape(N, C, HW)
    lf = l.reshape(N, num_p, C, K, HW)
    if HW8 != HW:
        pad = HW8 - HW
        xf = jnp.pad(xf, ((0, 0), (0, 0), (0, pad)))
        lf = jnp.pad(lf, ((0, 0), (0, 0), (0, 0), (0, 0), (0, pad)))
    x4 = xf.reshape(N, C, SB8, LS)
    l6 = lf.reshape(N, num_p, C, K, SB8, LS)

    grid = (N, C, num_s)
    io_spec = pl.BlockSpec((None, None, S8, LS), lambda n, c, s: (n, c, s, 0))
    l_spec = pl.BlockSpec((None, num_p, None, K, S8, LS),
                          lambda n, c, s: (n, 0, c, 0, s, 0))

    kern = functools.partial(dmll_kernel, bin_width=bin_width,
                             x_lower=x_lower, x_upper=x_upper, t=t)

    n_elems = N * C * HW8
    cost = pl.CostEstimate(
        flops=int(30 * K * n_elems),
        transcendentals=int((10 * K + 2) * n_elems),
        bytes_accessed=int(n_elems * (x4.dtype.itemsize + 4)
                           + n_elems * num_p * K * l6.dtype.itemsize),
    )

    out = pl.pallas_call(
        kern,
        out_shape=jax.ShapeDtypeStruct((N, C, SB8, LS), jnp.float32),
        grid_spec=pltpu.PrefetchScalarGridSpec(
            num_scalar_prefetch=0,
            grid=grid,
            in_specs=[io_spec, l_spec],
            out_specs=io_spec,
        ),
        compiler_params=pltpu.CompilerParams(
            dimension_semantics=("parallel", "parallel", "parallel"),
            vmem_limit_bytes=32 * 1024 * 1024,
        ),
        cost_estimate=cost,
    )(x4, l6)

    out = out.reshape(N, C, HW8)
    if HW8 != HW:
        out = out[:, :, :HW]
    return out.reshape(N, C, H, W)


def dmll_forward_ref(x, l, *, num_p=3, x_min=0.0, x_max=255.0, L=256, t=1.0):
    """Pure-JAX reference mirroring the PyTorch code exactly."""
    N, C, H, W = x.shape
    Kp = l.shape[1]
    K = Kp // (num_p * C)
    bin_width = (x_max - x_min) / (L - 1)
    x_lower = x_min + 0.001
    x_upper = x_max - 0.001

    l6 = l.reshape(N, num_p, C, K, H, W)
    logit_pis = l6[:, 0]
    means = l6[:, 1] * t
    log_scales = jnp.maximum(l6[:, 2], _LOG_SCALES_MIN)
    xb = x.reshape(N, C, 1, H, W)

    centered_x = jnp.abs(xb - means)
    inv_stdv = jnp.exp(-log_scales)
    plus_in = inv_stdv * (-centered_x + bin_width / 2.0)
    min_in = inv_stdv * (-centered_x - bin_width / 2.0)
    cdf_plus = jax.nn.sigmoid(plus_in)
    cdf_min = jax.nn.sigmoid(min_in)
    log_cdf_plus = plus_in - jax.nn.softplus(plus_in)
    log_one_minus_cdf_min = -jax.nn.softplus(min_in)
    out_A = jnp.log(jnp.maximum(cdf_plus - cdf_min, 1e-12))
    cond_B = (xb > x_upper).astype(jnp.float32)
    out_B = cond_B * log_one_minus_cdf_min + (1.0 - cond_B) * out_A
    cond_C = (xb < x_lower).astype(jnp.float32)
    log_probs = cond_C * log_cdf_plus + (1.0 - cond_C) * out_B
    log_sm = jax.nn.log_softmax(logit_pis, axis=2)
    lw = log_probs + log_sm
    return -jax.scipy.special.logsumexp(lw, axis=2)


if __name__ == "__main__":
    # Small shapes: N=2, C=4, H=W=16, K=4 mixtures, num_p=3 -> Kp=48
    N, C, H, W = 2, 4, 16, 16
    num_p, K = 3, 4
    Kp = num_p * C * K

    key = jax.random.PRNGKey(0)
    kx, kl = jax.random.split(key)
    # targets in [0, 255]
    x = jax.random.uniform(kx, (N, C, H, W), dtype=jnp.float32,
                           minval=0.0, maxval=255.0)
    # predicted distribution params (deterministic synthetic "network output")
    l = jax.random.normal(kl, (N, Kp, H, W), dtype=jnp.float32)

    out = dmll_forward(x, l, num_p=num_p)
    out = jax.block_until_ready(out)

    ref = dmll_forward_ref(x, l, num_p=num_p)
    np.testing.assert_allclose(np.asarray(out), np.asarray(ref),
                               rtol=2e-5, atol=2e-4)
    assert out.shape == (N, C, H, W)
    print("KERNEL_OK")
</pallas_src>

<mosaic_0001>
module attributes {stable_mosaic.version = 11 : i64} {
  func.func @dmll_kernel(%arg0: i32, %arg1: i32, %arg2: i32, %arg3: memref<1x1x8x128xf32, #tpu.memory_space<vmem>>, %arg4: memref<1x3x1x4x8x128xf32, #tpu.memory_space<vmem>>, %arg5: memref<1x1x8x128xf32, #tpu.memory_space<vmem>>) attributes {dimension_semantics = [#tpu.dimension_semantics<parallel>, #tpu.dimension_semantics<parallel>, #tpu.dimension_semantics<parallel>], iteration_bounds = array<i64: 2, 4, 1>, scalar_prefetch = 0 : i64, scratch_operands = 0 : i64, tpu.core_type = #tpu.core_type<tc>, window_params = [{transform_indices = @transform_0, window_bounds = array<i64: 1, 1, 8, 128>}, {transform_indices = @transform_1, window_bounds = array<i64: 1, 3, 1, 4, 8, 128>}, {transform_indices = @transform_2, window_bounds = array<i64: 1, 1, 8, 128>}]} {
    %c0 = arith.constant 0 : index
    %c0_0 = arith.constant 0 : index
    %c0_1 = arith.constant 0 : index
    %c0_2 = arith.constant 0 : index
    %0 = vector.load %arg3[%c0, %c0_0, %c0_1, %c0_2] : memref<1x1x8x128xf32, #tpu.memory_space<vmem>>, vector<1x1x8x128xf32>
    %1 = vector.shape_cast %0 : vector<1x1x8x128xf32> to vector<8x128xf32>
    %cst = arith.constant 2.549990e+02 : f32
    %2 = vector.broadcast %cst : f32 to vector<8x128xf32>
    %3 = arith.cmpf ogt, %1, %2 : vector<8x128xf32>
    %4 = vector.shape_cast %3 : vector<8x128xi1> to vector<1x8x128xi1>
    %cst_3 = arith.constant 1.000000e-03 : f32
    %5 = vector.broadcast %cst_3 : f32 to vector<8x128xf32>
    %6 = arith.cmpf olt, %1, %5 : vector<8x128xf32>
    %7 = vector.shape_cast %6 : vector<8x128xi1> to vector<1x8x128xi1>
    %8 = vector.shape_cast %1 : vector<8x128xf32> to vector<1x8x128xf32>
    %c0_4 = arith.constant 0 : index
    %c0_5 = arith.constant 0 : index
    %c0_6 = arith.constant 0 : index
    %c0_7 = arith.constant 0 : index
    %c0_8 = arith.constant 0 : index
    %c0_9 = arith.constant 0 : index
    %9 = vector.load %arg4[%c0_4, %c0_5, %c0_6, %c0_7, %c0_8, %c0_9] : memref<1x3x1x4x8x128xf32, #tpu.memory_space<vmem>>, vector<1x1x1x4x8x128xf32>
    %10 = vector.shape_cast %9 : vector<1x1x1x4x8x128xf32> to vector<4x8x128xf32>
    %c0_10 = arith.constant 0 : index
    %c1 = arith.constant 1 : index
    %c0_11 = arith.constant 0 : index
    %c0_12 = arith.constant 0 : index
    %c0_13 = arith.constant 0 : index
    %c0_14 = arith.constant 0 : index
    %11 = vector.load %arg4[%c0_10, %c1, %c0_11, %c0_12, %c0_13, %c0_14] : memref<1x3x1x4x8x128xf32, #tpu.memory_space<vmem>>, vector<1x1x1x4x8x128xf32>
    %12 = vector.shape_cast %11 : vector<1x1x1x4x8x128xf32> to vector<4x8x128xf32>
    %c0_15 = arith.constant 0 : index
    %c2 = arith.constant 2 : index
    %c0_16 = arith.constant 0 : index
    %c0_17 = arith.constant 0 : index
    %c0_18 = arith.constant 0 : index
    %c0_19 = arith.constant 0 : index
    %13 = vector.load %arg4[%c0_15, %c2, %c0_16, %c0_17, %c0_18, %c0_19] : memref<1x3x1x4x8x128xf32, #tpu.memory_space<vmem>>, vector<1x1x1x4x8x128xf32>
    %14 = vector.shape_cast %13 : vector<1x1x1x4x8x128xf32> to vector<4x8x128xf32>
    %cst_20 = arith.constant -7.000000e+00 : f32
    %15 = vector.broadcast %cst_20 : f32 to vector<4x8x128xf32>
    %16 = arith.maximumf %14, %15 : vector<4x8x128xf32>
    %cst_21 = arith.constant 0.000000e+00 : f32
    %17 = vector.broadcast %cst_21 : f32 to vector<4x8x128xf32>
    %18 = arith.subf %17, %16 : vector<4x8x128xf32>
    %19 = math.exp %18 : vector<4x8x128xf32>
    %20 = vector.broadcast %8 : vector<1x8x128xf32> to vector<4x8x128xf32>
    %21 = arith.subf %20, %12 : vector<4x8x128xf32>
    %22 = math.absf %21 : vector<4x8x128xf32>
    %cst_22 = arith.constant 5.000000e-01 : f32
    %23 = vector.broadcast %cst_22 : f32 to vector<4x8x128xf32>
    %24 = arith.subf %23, %22 : vector<4x8x128xf32>
    %25 = arith.mulf %19, %24 : vector<4x8x128xf32>
    %cst_23 = arith.constant -5.000000e-01 : f32
    %26 = vector.broadcast %cst_23 : f32 to vector<4x8x128xf32>
    %27 = arith.subf %26, %22 : vector<4x8x128xf32>
    %28 = arith.mulf %19, %27 : vector<4x8x128xf32>
    %29 = math.absf %25 : vector<4x8x128xf32>
    %cst_24 = arith.constant 0.000000e+00 : f32
    %30 = vector.broadcast %cst_24 : f32 to vector<4x8x128xf32>
    %31 = arith.subf %30, %29 : vector<4x8x128xf32>
    %32 = math.exp %31 : vector<4x8x128xf32>
    %cst_25 = arith.constant 0.000000e+00 : f32
    %33 = vector.broadcast %cst_25 : f32 to vector<4x8x128xf32>
    %34 = arith.maximumf %25, %33 : vector<4x8x128xf32>
    %35 = math.log1p %32 : vector<4x8x128xf32>
    %36 = arith.addf %34, %35 : vector<4x8x128xf32>
    %37 = arith.subf %25, %36 : vector<4x8x128xf32>
    %cst_26 = arith.constant 1.000000e+00 : f32
    %38 = vector.broadcast %cst_26 : f32 to vector<4x8x128xf32>
    %39 = arith.addf %38, %32 : vector<4x8x128xf32>
    %40 = tpu.reciprocal %39 {approx = true} : vector<4x8x128xf32> -> vector<4x8x128xf32>
    %41 = arith.mulf %39, %40 : vector<4x8x128xf32>
    %cst_27 = arith.constant 2.000000e+00 : f32
    %42 = vector.broadcast %cst_27 : f32 to vector<4x8x128xf32>
    %43 = arith.subf %42, %41 : vector<4x8x128xf32>
    %44 = arith.mulf %40, %43 : vector<4x8x128xf32>
    %45 = arith.mulf %39, %44 : vector<4x8x128xf32>
    %cst_28 = arith.constant 2.000000e+00 : f32
    %46 = vector.broadcast %cst_28 : f32 to vector<4x8x128xf32>
    %47 = arith.subf %46, %45 : vector<4x8x128xf32>
    %48 = arith.mulf %44, %47 : vector<4x8x128xf32>
    %cst_29 = arith.constant 0.000000e+00 : f32
    %49 = vector.broadcast %cst_29 : f32 to vector<4x8x128xf32>
    %50 = arith.cmpf oge, %25, %49 : vector<4x8x128xf32>
    %51 = arith.mulf %32, %48 : vector<4x8x128xf32>
    %52 = arith.select %50, %48, %51 : vector<4x8x128xi1>, vector<4x8x128xf32>
    %53 = math.exp %28 : vector<4x8x128xf32>
    %54 = math.log1p %53 : vector<4x8x128xf32>
    %cst_30 = arith.constant 0.000000e+00 : f32
    %55 = vector.broadcast %cst_30 : f32 to vector<4x8x128xf32>
    %56 = arith.subf %55, %54 : vector<4x8x128xf32>
    %cst_31 = arith.constant 1.000000e+00 : f32
    %57 = vector.broadcast %cst_31 : f32 to vector<4x8x128xf32>
    %58 = arith.addf %57, %53 : vector<4x8x128xf32>
    %59 = tpu.reciprocal %58 {approx = true} : vector<4x8x128xf32> -> vector<4x8x128xf32>
    %60 = arith.mulf %58, %59 : vector<4x8x128xf32>
    %cst_32 = arith.constant 2.000000e+00 : f32
    %61 = vector.broadcast %cst_32 : f32 to vector<4x8x128xf32>
    %62 = arith.subf %61, %60 : vector<4x8x128xf32>
    %63 = arith.mulf %59, %62 : vector<4x8x128xf32>
    %64 = arith.mulf %58, %63 : vector<4x8x128xf32>
    %cst_33 = arith.constant 2.000000e+00 : f32
    %65 = vector.broadcast %cst_33 : f32 to vector<4x8x128xf32>
    %66 = arith.subf %65, %64 : vector<4x8x128xf32>
    %67 = arith.mulf %63, %66 : vector<4x8x128xf32>
    %68 = arith.mulf %53, %67 : vector<4x8x128xf32>
    %69 = arith.subf %52, %68 : vector<4x8x128xf32>
    %cst_34 = arith.constant 9.99999996E-13 : f32
    %70 = vector.broadcast %cst_34 : f32 to vector<4x8x128xf32>
    %71 = arith.maximumf %69, %70 : vector<4x8x128xf32>
    %72 = math.log %71 : vector<4x8x128xf32>
    %73 = vector.shape_cast %4 : vector<1x8x128xi1> to vector<1x8x128xi1>
    %74 = vector.broadcast %73 : vector<1x8x128xi1> to vector<4x8x128xi1>
    %75 = arith.select %74, %56, %72 : vector<4x8x128xi1>, vector<4x8x128xf32>
    %76 = vector.shape_cast %7 : vector<1x8x128xi1> to vector<1x8x128xi1>
    %77 = vector.broadcast %76 : vector<1x8x128xi1> to vector<4x8x128xi1>
    %78 = arith.select %77, %37, %75 : vector<4x8x128xi1>, vector<4x8x128xf32>
    %79 = arith.addf %10, %78 : vector<4x8x128xf32>
    %cst_35 = arith.constant dense<0xFF800000> : vector<8x128xf32>
    %80 = vector.multi_reduction <maximumf>, %79, %cst_35 [0] : vector<4x8x128xf32> to vector<8x128xf32>
    %81 = vector.shape_cast %80 : vector<8x128xf32> to vector<1x8x128xf32>
    %82 = vector.broadcast %81 : vector<1x8x128xf32> to vector<4x8x128xf32>
    %83 = arith.subf %79, %82 : vector<4x8x128xf32>
    %84 = math.exp %83 : vector<4x8x128xf32>
    %cst_36 = arith.constant dense<0.000000e+00> : vector<8x128xf32>
    %85 = vector.multi_reduction <add>, %84, %cst_36 [0] : vector<4x8x128xf32> to vector<8x128xf32>
    %86 = math.log %85 : vector<8x128xf32>
    %87 = arith.addf %80, %86 : vector<8x128xf32>
    %cst_37 = arith.constant dense<0xFF800000> : vector<8x128xf32>
    %88 = vector.multi_reduction <maximumf>, %10, %cst_37 [0] : vector<4x8x128xf32> to vector<8x128xf32>
    %89 = vector.shape_cast %88 : vector<8x128xf32> to vector<1x8x128xf32>
    %90 = vector.broadcast %89 : vector<1x8x128xf32> to vector<4x8x128xf32>
    %91 = arith.subf %10, %90 : vector<4x8x128xf32>
    %92 = math.exp %91 : vector<4x8x128xf32>
    %cst_38 = arith.constant dense<0.000000e+00> : vector<8x128xf32>
    %93 = vector.multi_reduction <add>, %92, %cst_38 [0] : vector<4x8x128xf32> to vector<8x128xf32>
    %94 = math.log %93 : vector<8x128xf32>
    %95 = arith.addf %88, %94 : vector<8x128xf32>
    %96 = arith.subf %95, %87 : vector<8x128xf32>
    %c0_39 = arith.constant 0 : index
    %c0_40 = arith.constant 0 : index
    %c0_41 = arith.constant 0 : index
    %c0_42 = arith.constant 0 : index
    %97 = vector.load %arg5[%c0_39, %c0_40, %c0_41, %c0_42] : memref<1x1x8x128xf32, #tpu.memory_space<vmem>>, vector<1x1x8x128xf32>
    %98 = vector.shape_cast %97 : vector<1x1x8x128xf32> to vector<8x128xf32>
    %99 = vector.shape_cast %96 : vector<8x128xf32> to vector<1x1x8x128xf32>
    tpu.vector_store %arg5[%c0_39, %c0_40, %c0_41, %c0_42], %99 {strides = array<i32>} : memref<1x1x8x128xf32, #tpu.memory_space<vmem>>, vector<1x1x8x128xf32>,
    return
  }
  func.func @transform_0(%arg0: i32, %arg1: i32, %arg2: i32) -> (i32, i32, i32, i32) {
    %c0_i32 = arith.constant 0 : i32
    %c0_i32_0 = arith.constant 0 : i32
    return %arg0, %arg1, %arg2, %c0_i32 : i32, i32, i32, i32
  }
  func.func @transform_1(%arg0: i32, %arg1: i32, %arg2: i32) -> (i32, i32, i32, i32, i32, i32) {
    %c0_i32 = arith.constant 0 : i32
    %c0_i32_0 = arith.constant 0 : i32
    %c0_i32_1 = arith.constant 0 : i32
    %c0_i32_2 = arith.constant 0 : i32
    return %arg0, %c0_i32, %arg1, %c0_i32_0, %arg2, %c0_i32_1 : i32, i32, i32, i32, i32, i32
  }
  func.func @transform_2(%arg0: i32, %arg1: i32, %arg2: i32) -> (i32, i32, i32, i32) {
    %c0_i32 = arith.constant 0 : i32
    %c0_i32_0 = arith.constant 0 : i32
    return %arg0, %arg1, %arg2, %c0_i32 : i32, i32, i32, i32
  }
}

</mosaic_0001>

<bundles_post_ra>
// kernel: tpu_custom_call.1
= control target key start
LH: loop header
LB: loop body
LE: loop exit
PB: predicated region body
PF: predicated region fallthrough
CT: control target
= control target key end

     0   :  { %7 = vsyncpa [#allocation3], 0  ;;  %s1504_s0 = inlined_call_operand.hbm [shape: f32[2,4,8,128], index: 0, kind: input, shape index: {}]   ;;  %s1505_s1 = inlined_call_operand.hbm [shape: f32[2,3,4,4,8,128], index: 1, kind: input, shape index: {}]   ;;  %s1506_s2 = inlined_call_operand.hbm [shape: f32[2,4,8,128], index: 2, kind: output, shape index: {}]  }
   0x1   :  { %9 = vsyncpa [#allocation3 + $0x1], 0 }
   0x2   :  { %10 = vsyncpa [#allocation6], 0 }
   0x3   :  { %12 = vsyncpa [#allocation6 + $0x1], 0 }
   0x4   :  { %13 = vsyncpa [#allocation4], 0 }
   0x5   :  { %15 = vsyncpa [#allocation4 + $0x1], 0  ;;  %s1073_s9 = smov 0   ;;  %s1075_s10 = smov 0  }
   0x6   :  { %s1077_s11 = smov 0   ;;  %s1079_s12 = smov 0  }
   0x7   :  { %s1081_s13 = smov 0   ;;  %s1083_s14 = smov 0  }
   0x8   :  { %s1085_s15 = smov 0   ;;  %s1087_s16 = smov 0  }
   0x9 LB: > { %s720_s17 = sadd.s32 4294967295, %s1048_s16   ;;  %s721_s18 = sadd.s32 4294967294, %s1048_s16   ;;  %s1048_s16 = sphi %s1087_s16, %s21_s16   ;;  %s1044_s15 = sphi %s1085_s15, %s1539_s15   ;;  %s1040_s14 = sphi %s1083_s14, %s1538_s14   ;;  %s1036_s13 = sphi %s1081_s13, %s1537_s13   ;;  %s1032_s12 = sphi %s1079_s12, %s1536_s12   ;;  %s1028_s11 = sphi %s1077_s11, %s1535_s11   ;;  %s1024_s10 = sphi %s1075_s10, %s1534_s10   ;;  %s1020_s9 = sphi %s1073_s9, %s1533_s9  }
   0xa   : > { %s36_s19 = sadd.s32 1, %s1040_s14  ;;  %s40_s20 = sadd.s32 1, %s1044_s15 }
   0xb   : > { %p38_p0 = scmp.ge.s32.totalorder %s36_s19, 4  ;;  %p58_p1 = scmp.ne.s32.totalorder %s1028_s11, %s1024_s10 }
   0xc   : > { %p59_p2 = scmp.eq.s32.totalorder %s1048_s16, 0  ;;  %p64_p5 = scmp.ne.s32.totalorder %s1024_s10, %s1020_s9 }
   0xd   : > { %s1541_s19 = smov (%p38_p0, %s36_s19), 0  ;;  %s1543_s20 = smov (!%p38_p0, %s40_s20), %s1044_s15 }
   0xe   : > { %1509 = sst [smem:[#allocation14_spill]] %s1541_s19  ;;  %s45_s21 = ssub.s32 %s1040_s14, %s1541_s19 }
   0xf   : > { %p1125_p3 = por %p59_p2, %p58_p1  ;;  %p42_p4 = scmp.ge.s32.totalorder %s1543_s20, 2 }
  0x10   : > { %p65_p6 = scmp.eq.s32.totalorder %s720_s17, 0  ;;  %p122_p7 = scmp.eq.s32.totalorder %s720_s17, 7 }
  0x11   : > { %s1545_s20 = smov (%p42_p4, %s1543_s20), 0  ;;  %p128_p10 = scmp.eq.s32.totalorder %s721_s18, 7 }
  0x12   : > { %1511 = sst [smem:[#allocation15_spill]] %s1545_s20  ;;  %p1133_p8 = por %p65_p6, %p64_p5 }
  0x13   : > { %p1137_p9 = por %p122_p7, %p58_p1  ;;  %s44_s25 = ssub.s32 %s1044_s15, %s1545_s20 }
  0x14   : > { %s46_s26 = sor.u32 %s45_s21, %s44_s25  ;;  %s51_s27 = sadd.s32 1, %s1028_s11 }
  0x15   : > { %p49_p11 = scmp.eq.s32.totalorder %s46_s26, 0  ;;  %p1144_p12 = por %p128_p10, %p64_p5 }
  0x16   : > { %p723_p13 = scmp.ge.s32.totalorder %s1048_s16, 8 }
  0x17   : > { %s1149_s29 = scalar_select %p49_p11, %s1028_s11, %s51_s27  }
  0x18   : > { %144 = sbr.rel (%p723_p13) target bundleno = 55 (0x37), region = 16  ;;  %s1153_s30 = sand.u32 (!%p723_p13), 1, %s1028_s11  }
  0x19   : > { %s725_s3 = sshll.u32 (!%p723_p13), %s1044_s15, 2  ;;  %s724_s4 = sshll.u32 (!%p723_p13), %s1153_s30, 3 }
  0x1a   : > { %s158_s5 = sadd.s32 (!%p723_p13), %s1040_s14, %s725_s3  ;;  %s152_s7 = scalar_lea.vmem (!%p723_p13), [#allocation2], %s724_s4 }
  0x1b   : > { %s726_s6 = sshll.u32 (!%p723_p13), %s158_s5, 7  ;;  %s162_s8 = sshll.u32 (!%p723_p13), %s152_s7, 4  ;;  %s163_s8 = int_to_ptr.vmem [resolvable:$true] %s162_s8 }
  0x1c   : > { %s160_s21 = scalar_lea.hbm (!%p723_p13), %s1504_s0, %s726_s6  ;;  %s149_s25 = scalar_lea.sflag (!%p723_p13), [#allocation3], %s1153_s30 }
  0x1d   : > { %s934_s26 = scalar_lea.vmem %s163_s8, 128  ;;  %s1050_s27 = smov [#allocation2]  }
  0x1e   : > { %p935_p0 = scmp.ne.s32.totalorder %s163_s8, %s934_s26  ;;  %s938_s20 = sshll.u32 %s1050_s27, 4  ;;  %s939_s20 = int_to_ptr.vmem [resolvable:$false] %s938_s20 }
  0x1f   : > { %s940_s19 = scalar_lea.vmem %s939_s20, 256  ;;  %p941_p4 = scmp.lt.s32.totalorder %s163_s8, %s939_s20 }
  0x20   : > { %p936_p1 = pnand %p935_p0, %p1125_p3  ;;  %p942_p5 = scmp.lt.s32.totalorder %s940_s19, %s934_s26 }
  0x22   : > { %p937_p2 = pneg %p936_p1  ;;  %p943_p6 = por %p942_p5, %p941_p4 }
  0x24   : > { %p944_p7 = pnand %p943_p6, %p937_p2 }
  0x26   : > { %947 = shalt.err (!%p944_p7)
}
  0x27   : > { %750 = dma.hbm_to_vmem [thread:$0]  (%p1125_p3), %s160_s21, 128, %s163_s8, %s149_s25  }
  0x28   : > { %s747_s3 = smul.u32 96, %s1153_s30  ;;  %s727_s4 = sshll.u32 %s1040_s14, 2 }
  0x29   : > { %s748_s5 = smul.u32 48, %s1044_s15  ;;  %s1051_s7 = smov 2048  }
  0x2a   : > { %s173_s19 = scalar_lea.vmem [#allocation5], %s747_s3  ;;  %752 = sst [smem:[#allocation9]] (%p1125_p3), %s1051_s7 }
  0x2b   : > { %s180_s6 = sadd.s32 %s748_s5, %s727_s4  ;;  %s195_s20 = sshll.u32 %s173_s19, 4  ;;  %s196_s20 = int_to_ptr.vmem [resolvable:$true] %s195_s20 }
  0x2c   : > { %s751_s8 = scalar_select %p1125_p3, [#allocation0], [#allocation10] }
  0x2d   : > { %s728_s18 = sshll.u32 %s180_s6, 7  ;;  %s1052_s21 = smov 512  }
  0x2e   : > { %s187_s17 = sld [smem:[%s751_s8]]   ;;  %s1053_s25 = smov 4  }
  0x2f   : > { %753 = sst [smem:[#allocation9 + $0x1]] (%p1125_p3), %s1052_s21  ;;  %s1054_s26 = smov 128  }
  0x30   : > { %754 = sst [smem:[#allocation9 + $0x2]] (%p1125_p3), %s1053_s25  ;;  %s182_s4 = scalar_lea.hbm %s1505_s1, %s728_s18 }
  0x31   : > { %755 = sst [smem:[#allocation9 + $0x3]] (%p1125_p3), %s1054_s26  ;;  %s1055_s5 = smov 8  }
  0x32   : > { %756 = sst [smem:[#allocation9 + $0x4]] (%p1125_p3), %s1054_s26  ;;  %s170_s7 = scalar_lea.sflag [#allocation6], %s1153_s30 }
  0x33   : > { %757 = sst [smem:[#allocation9 + $0x5]] (%p1125_p3), %s1055_s5  ;;  %s1056_s8 = smov 131072  }
  0x34   : > { %s729_s6 = sshll.u32 %s187_s17, 26 }
  0x35   : > { %s730_s19 = sadd.s32 134217728, %s729_s6 }
  0x36   : > { %758 = dma.general (%p1125_p3), %s182_s4, 1536, %s196_s20, %s170_s7, %s1056_s8, [#allocation9], %s730_s19, 0  }
  0x37 PF: > { %p731_p10 = scmp.ge.s32.totalorder %s1048_s16, 1  ;;  %p216_p11 = scmp.lt.s32.totalorder %s1048_s16, 9 }
  0x39   : > { %p217_p13 = pnand %p731_p10, %p216_p11 }
  0x3a   : > { %s1192_s18 = sand.u32 (!%p217_p13), 1, %s1024_s10  }
  0x3b   : > { %220 = sbr.rel (%p217_p13) target bundleno = 237 (0xed), region = 28  ;;  %s732_s17 = sshll.u32 (!%p217_p13), %s1192_s18, 3 }
  0x3c   : > { %s223_s21 = scalar_lea.sflag (!%p217_p13), [#allocation3], %s1192_s18  ;;  %s226_s30 = scalar_lea.vmem (!%p217_p13), [#allocation2], %s732_s17 }
  0x40   : > { %1007 = dma.done.wait (%p1133_p8), %s223_s21, 128  }
  0x41   : > { %1009 = vsyncadd (%p1133_p8), %s223_s21, 4294967168  ;;  %s749_s22 = smul.u32 96, %s1192_s18  ;;  %s232_s20 = scalar_lea.sflag [#allocation6], %s1192_s18 }
  0x43   : > { %s1204_s25 = scalar_lea.vmem [#allocation5], %s749_s22 }
  0x44   : > { %1011 = dma.done.wait (%p1133_p8), %s232_s20, 1536  }
  0x45   : > { %1013 = vsyncadd (%p1133_p8), %s232_s20, 4294965760  ;;  %v738_v0 = vld [vmem:[%s1204_s25 + $0x40] sm:$0xff]  ;;  %v739_v1 = vld [vmem:[%s1204_s25 + $0x48] sm:$0xff]  ;;  %s743_s23 = sshll.u32 %s1036_s13, 2  ;;  %s260_s3 = scalar_lea.vmem [#allocation7], %s732_s17 }
  0x46   : > { %v740_v2 = vld [vmem:[%s1204_s25 + $0x50] sm:$0xff]  ;;  %v741_v3 = vld [vmem:[%s1204_s25 + $0x58] sm:$0xff]  ;;  %v278_v4 = vmax.f32 %v738_v0, -7.0  ;;  %v279_v5 = vmax.f32 %v739_v1, -7.0  ;;  %v734_v15 = vld [vmem:[%s1204_s25 + $0x20] sm:$0xff]  ;;  %s599_s26 = sadd.s32 %s1032_s12, %s743_s23  ;;  %s603_s4 = sshll.u32 %s260_s3, 4  ;;  %s604_s4 = int_to_ptr.vmem [resolvable:$true] %s603_s4 }
  0x47   : > { %v280_v6 = vmax.f32 %v740_v2, -7.0  ;;  %v281_v7 = vmax.f32 %v741_v3, -7.0  ;;  %v1214_v14 = vld [vmem:[%s226_s30] sm:$0xff]  ;;  %v735_v18 = vld [vmem:[%s1204_s25 + $0x28] sm:$0xff]  ;;  %s744_s27 = sshll.u32 %s599_s26, 7  ;;  %s587_s13 = scalar_lea.sflag [#allocation4], %s1192_s18 }
  0x48   : > { %v282_v8 = vsub.f32 0.0, %v278_v4  ;;  %v283_v9 = vsub.f32 0.0, %v279_v5  ;;  %v736_v19 = vld [vmem:[%s1204_s25 + $0x30] sm:$0xff]  ;;  %v737_v20 = vld [vmem:[%s1204_s25 + $0x38] sm:$0xff]  ;;  %v294_v21 = vsub.f32 %v1214_v14, %v734_v15  ;;  %v295_v22 = vsub.f32 %v1214_v14, %v735_v18  ;;  %v1279_v18 = vld [vmem:[%s1204_s25] sm:$0xff]  ;;  %s601_s19 = scalar_lea.hbm %s1506_s2, %s744_s27  ;;  %s948_s7 = scalar_lea.vmem %s604_s4, 128 }
  0x49   : > { %v284_v10 = vsub.f32 0.0, %v280_v6  ;;  %v285_v11 = vsub.f32 0.0, %v281_v7  ;;  %v296_v23 = vsub.f32 %v1214_v14, %v736_v19  ;;  %v297_v24 = vsub.f32 %v1214_v14, %v737_v20  ;;  %v1282_v20 = vld [vmem:[%s1204_s25 + $0x8] sm:$0xff]  ;;  %p949_p3 = scmp.ne.s32.totalorder %s604_s4, %s948_s7  ;;  %s1057_s12 = smov [#allocation7]  }
  0x4a   : > { %v286_v12 = vmul.f32 1.442695, %v282_v8  ;;  %v288_v13 = vmul.f32 1.442695, %v283_v9  ;;  %v298_v25 = vand.u32 2147483647, %v294_v21 }
  0x4b   : > { %v290_v16 = vmul.f32 1.442695, %v284_v10  ;;  %v292_v17 = vmul.f32 1.442695, %v285_v11  ;;  %v299_v26 = vand.u32 2147483647, %v295_v22  ;;  %p950_p8 = pnand %p949_p3, %p1137_p9 }
  0x4c   : > { %838 = vpow2.f32 %v286_v12  ;;  %v300_v27 = vand.u32 2147483647, %v296_v23  ;;  %v301_v28 = vand.u32 2147483647, %v297_v24  ;;  %v302_v29 = vsub.f32 0.5, %v298_v25  ;;  %v1285_v21 = vld [vmem:[%s1204_s25 + $0x10] sm:$0xff] }
  0x4d   : > { %840 = vpow2.f32 %v288_v13  ;;  %v303_v30 = vsub.f32 0.5, %v299_v26  ;;  %v310_v45 = vsub.f32 -0.5, %v298_v25  ;;  %v311_v48 = vsub.f32 -0.5, %v299_v26  ;;  %v1288_v22 = vld [vmem:[%s1204_s25 + $0x18] sm:$0xff]  ;;  %p951_p0 = pneg %p950_p8  ;;  %s952_s8 = sshll.u32 %s1057_s12, 4  ;;  %s953_s8 = int_to_ptr.vmem [resolvable:$false] %s952_s8 }
  0x4e   : > { %842 = vpow2.f32 %v290_v16  ;;  %v304_v31 = vsub.f32 0.5, %v300_v27  ;;  %v305_v33 = vsub.f32 0.5, %v301_v28  ;;  %v312_v51 = vsub.f32 -0.5, %v300_v27  ;;  %s954_s21 = scalar_lea.vmem %s953_s8, 256  ;;  %p955_p1 = scmp.lt.s32.totalorder %s604_s4, %s953_s8 }
  0x4f   : > { %844 = vpow2.f32 %v292_v17  ;;  %v313_v54 = vsub.f32 -0.5, %v301_v28  ;;  %v563_v25 = vmax.f32 %v1279_v18, %v1282_v20  ;;  %v564_v26 = vmax.f32 %v1285_v21, %v1288_v22  ;;  %p956_p2 = scmp.lt.s32.totalorder %s954_s21, %s948_s7 }
  0x50   : > { %vm262_vm12 = vcmp.gt.f32.partialorder %v1214_v14, 254.999  ;;  %vm263_vm13 = vcmp.lt.f32.partialorder %v1214_v14, 0.001 }
  0x51   : > { %p957_p4 = por %p956_p2, %p955_p1 }
  0x53   : > { %p958_p5 = pnand %p957_p4, %p951_p0 }
  0x59   : > { %v839_v32 = vpop.eup %838 }
  0x5a   : > { %v841_v34 = vpop.eup %840  ;;  %v1224_v35 = vmul.f32 %v839_v32, %v302_v29  ;;  %v314_v56 = vmul.f32 %v839_v32, %v310_v45 }
  0x5b   : > { %v843_v36 = vpop.eup %842  ;;  %v1226_v37 = vmul.f32 %v841_v34, %v303_v30  ;;  %v315_v58 = vmul.f32 %v841_v34, %v311_v48 }
  0x5c   : > { %v845_v38 = vpop.eup %844  ;;  %v1228_v39 = vmul.f32 %v843_v36, %v304_v31  ;;  %v318_v40 = vand.u32 2147483647, %v1224_v35  ;;  %v316_v59 = vmul.f32 %v843_v36, %v312_v51  ;;  %v426_v61 = vmul.f32 1.442695, %v314_v56 }
  0x5d   : > { %v1231_v41 = vmul.f32 %v845_v38, %v305_v33  ;;  %v319_v42 = vand.u32 2147483647, %v1226_v37  ;;  %v317_v60 = vmul.f32 %v845_v38, %v313_v54  ;;  %v428_v62 = vmul.f32 1.442695, %v315_v58 }
  0x5e   : > { %v320_v43 = vand.u32 2147483647, %v1228_v39  ;;  %v322_v44 = vsub.f32 0.0, %v318_v40  ;;  %v430_v63 = vmul.f32 1.442695, %v316_v59  ;;  %v1296_v38 = vmax.f32 %v563_v25, %v564_v26 }
  0x5f   : > { %v321_v46 = vand.u32 2147483647, %v1231_v41  ;;  %v323_v47 = vsub.f32 0.0, %v319_v42  ;;  %v432_v0 = vmul.f32 1.442695, %v317_v60  ;;  %v336_v54 = vmax.f32 %v1228_v39, 0.0 }
  0x60   : > { %v324_v49 = vsub.f32 0.0, %v320_v43  ;;  %v326_v50 = vmul.f32 1.442695, %v322_v44  ;;  %v566_v51 = vsub.f32 %v1279_v18, %v1296_v38  ;;  %vm414_vm0 = vcmp.ge.f32.partialorder %v1224_v35, 0.0 }
  0x61   : > { %v325_v52 = vsub.f32 0.0, %v321_v46  ;;  %v328_v53 = vmul.f32 1.442695, %v323_v47  ;;  %vm415_vm1 = vcmp.ge.f32.partialorder %v1226_v37, 0.0  ;;  %vm416_vm2 = vcmp.ge.f32.partialorder %v1228_v39, 0.0 }
  0x62   : > { %v330_v55 = vmul.f32 1.442695, %v324_v49  ;;  %846 = vpow2.f32 %v326_v50  ;;  %v334_v49 = vmax.f32 %v1224_v35, 0.0  ;;  %vm417_vm3 = vcmp.ge.f32.partialorder %v1231_v41, 0.0 }
  0x63   : > { %v332_v57 = vmul.f32 1.442695, %v325_v52  ;;  %848 = vpow2.f32 %v328_v53  ;;  %v335_v53 = vmax.f32 %v1226_v37, 0.0 }
  0x64   : > { %850 = vpow2.f32 %v330_v55 }
  0x65   : > { %852 = vpow2.f32 %v332_v57  ;;  %v337_v57 = vmax.f32 %v1231_v41, 0.0 }
  0x66   : > { %854 = vpow2.f32 %v426_v61 }
  0x67   : > { %856 = vpow2.f32 %v428_v62 }
  0x68   : > { %858 = vpow2.f32 %v430_v63 }
  0x69   : > { %860 = vpow2.f32 %v432_v0 }
  0x6f   : > { %v1236_v1 = vpop.eup %846 }
  0x70   : > { %v1238_v2 = vpop.eup %848  ;;  %v338_v5 = vadd.f32 1.0, %v1236_v1  ;;  %v341_v0 = vmul.f32 -0.5, %v1236_v1 }
  0x71   : > { %v1240_v3 = vpop.eup %850  ;;  %v347_v6 = vadd.f32 1.0, %v1238_v2 }
  0x72   : > { %v1242_v4 = vpop.eup %852  ;;  %v1247_v7 = vadd.f32 1.0, %v1240_v3  ;;  %862 = vrcp.f32 %v338_v5 }
  0x73   : > { %v1250_v8 = vadd.f32 1.0, %v1242_v4  ;;  %v1252_v9 = vpop.eup %854  ;;  %864 = vrcp.f32 %v347_v6 }
  0x74   : > { %v1254_v10 = vpop.eup %856  ;;  %866 = vrcp.f32 %v1247_v7  ;;  %v1263_v13 = vadd.f32 1.0, %v1252_v9 }
  0x75   : > { %v1257_v11 = vpop.eup %858  ;;  %868 = vrcp.f32 %v1250_v8  ;;  %v1266_v15 = vadd.f32 1.0, %v1254_v10 }
  0x76   : > { %v1260_v12 = vpop.eup %860  ;;  %v1269_v16 = vadd.f32 1.0, %v1257_v11  ;;  %870 = vrcp.f32 %v1263_v13 }
  0x77   : > { %v1272_v17 = vadd.f32 1.0, %v1260_v12  ;;  %872 = vrcp.f32 %v1266_v15 }
  0x78   : > { %874 = vrcp.f32 %v1269_v16 }
  0x79   : > { %876 = vrcp.f32 %v1272_v17 }
  0x7a   : > { %878 = vlog2.f32 %v338_v5 }
  0x7b   : > { %880 = vlog2.f32 %v347_v6 }
  0x7c   : > { %882 = vlog2.f32 %v1247_v7 }
  0x7d   : > { %884 = vlog2.f32 %v1250_v8 }
  0x7e   : > { %886 = vlog2.f32 %v1263_v13 }
  0x7f   : > { %v863_v19 = vpop.eup %862  ;;  %888 = vlog2.f32 %v1266_v15 }
  0x80   : > { %v865_v23 = vpop.eup %864  ;;  %v390_v24 = vmul.f32 %v863_v19, %v338_v5  ;;  %890 = vlog2.f32 %v1269_v16 }
  0x81   : > { %v867_v27 = vpop.eup %866  ;;  %v391_v28 = vmul.f32 %v865_v23, %v347_v6  ;;  %892 = vlog2.f32 %v1272_v17 }
  0x82   : > { %v869_v29 = vpop.eup %868  ;;  %v392_v30 = vmul.f32 %v867_v27, %v1247_v7  ;;  %v394_v31 = vsub.f32 2.0, %v390_v24 }
  0x83   : > { %v393_v32 = vmul.f32 %v869_v29, %v1250_v8  ;;  %v395_v33 = vsub.f32 2.0, %v391_v28  ;;  %v871_v45 = vpop.eup %870 }
  0x84   : > { %v396_v34 = vsub.f32 2.0, %v392_v30  ;;  %v398_v36 = vmul.f32 %v863_v19, %v394_v31  ;;  %v873_v48 = vpop.eup %872  ;;  %v482_v62 = vmul.f32 %v871_v45, %v1263_v13  ;;  %v344_v19 = vand.u32 2147483647, %v1236_v1 }
  0x85   : > { %v397_v40 = vsub.f32 2.0, %v393_v32  ;;  %v399_v42 = vmul.f32 %v865_v23, %v395_v33  ;;  %v875_v52 = vpop.eup %874  ;;  %v483_v63 = vmul.f32 %v873_v48, %v1266_v15  ;;  %v350_v32 = vmul.f32 -0.5, %v1238_v2 }
  0x86   : > { %v400_v43 = vmul.f32 %v867_v27, %v396_v34  ;;  %v402_v44 = vmul.f32 %v398_v36, %v338_v5  ;;  %v877_v56 = vpop.eup %876  ;;  %v484_v5 = vmul.f32 %v875_v52, %v1269_v16  ;;  %v486_v23 = vsub.f32 2.0, %v482_v62 }
  0x87   : > { %v401_v46 = vmul.f32 %v869_v29, %v397_v40  ;;  %v403_v47 = vmul.f32 %v399_v42, %v347_v6  ;;  %v485_v6 = vmul.f32 %v877_v56, %v1272_v17  ;;  %v487_v24 = vsub.f32 2.0, %v483_v63 }
  0x88   : > { %v404_v50 = vmul.f32 %v400_v43, %v1247_v7  ;;  %v406_v58 = vsub.f32 2.0, %v402_v44  ;;  %v488_v27 = vsub.f32 2.0, %v484_v5  ;;  %v490_v30 = vmul.f32 %v871_v45, %v486_v23 }
  0x89   : > { %v405_v55 = vmul.f32 %v401_v46, %v1250_v8  ;;  %v407_v59 = vsub.f32 2.0, %v403_v47  ;;  %v489_v28 = vsub.f32 2.0, %v485_v6  ;;  %v491_v31 = vmul.f32 %v873_v48, %v487_v24 }
  0x8a   : > { %v408_v60 = vsub.f32 2.0, %v404_v50  ;;  %v410_v25 = vmul.f32 %v406_v58, %v398_v36  ;;  %v492_v33 = vmul.f32 %v875_v52, %v488_v27  ;;  %v353_v40 = vand.u32 2147483647, %v1238_v2 }
  0x8b   : > { %v409_v61 = vsub.f32 2.0, %v405_v55  ;;  %v411_v26 = vmul.f32 %v407_v59, %v399_v42  ;;  %v493_v34 = vmul.f32 %v877_v56, %v489_v28  ;;  %v494_v8 = vmul.f32 %v490_v30, %v1263_v13  ;;  %v879_v59 = vpop.eup %878 }
  0x8c   : > { %v412_v29 = vmul.f32 %v408_v60, %v400_v43  ;;  %v495_v36 = vmul.f32 %v491_v31, %v1266_v15  ;;  %v418_v42 = vmul.f32 %v1236_v1, %v410_v25  ;;  %v496_v44 = vmul.f32 %v492_v33, %v1269_v16 }
  0x8d   : > { %v413_v7 = vmul.f32 %v409_v61, %v401_v46  ;;  %v419_v43 = vmul.f32 %v1238_v2, %v411_v26  ;;  %v497_v45 = vmul.f32 %v493_v34, %v1272_v17  ;;  %v498_v48 = vsub.f32 2.0, %v494_v8 }
  0x8e   : > { %v420_v46 = vmul.f32 %v1240_v3, %v412_v29  ;;  %v499_v50 = vsub.f32 2.0, %v495_v36  ;;  %v342_v52 = vadd.f32 1.0, %v341_v0  ;;  %v500_v13 = vsub.f32 2.0, %v496_v44  ;;  %v881_v0 = vpop.eup %880 }
  0x8f   : > { %v421_v47 = vmul.f32 %v1242_v4, %v413_v7  ;;  %v501_v55 = vsub.f32 2.0, %v497_v45  ;;  %v359_v15 = vmul.f32 -0.5, %v1240_v3  ;;  %v502_v56 = vmul.f32 %v498_v48, %v490_v30  ;;  %v883_v28 = vpop.eup %882 }
  0x90   : > { %v503_v58 = vmul.f32 %v499_v50, %v491_v31  ;;  %v422_v60 = vsel %vm414_vm0, %v410_v25, %v418_v42  ;;  %v423_v61 = vsel %vm415_vm1, %v411_v26, %v419_v43  ;;  %v504_v62 = vmul.f32 %v500_v13, %v492_v33  ;;  %v885_v33 = vpop.eup %884 }
  0x91   : > { %v505_v63 = vmul.f32 %v501_v55, %v493_v34  ;;  %v424_v16 = vsel %vm416_vm2, %v412_v29, %v420_v46  ;;  %v425_v5 = vsel %vm417_vm3, %v413_v7, %v421_v47  ;;  %v506_v17 = vmul.f32 %v1252_v9, %v502_v56  ;;  %v887_v50 = vpop.eup %886 }
  0x92   : > { %v507_v6 = vmul.f32 %v1254_v10, %v503_v58  ;;  %vm1343_vm4 = vcmp.lt.f32.partialorder %v344_v19, 0.0004427343  ;;  %v351_v24 = vadd.f32 1.0, %v350_v32  ;;  %v362_v25 = vand.u32 2147483647, %v1240_v3 }
  0x93   : > { %v508_v26 = vmul.f32 %v1257_v11, %v504_v62  ;;  %v509_v27 = vmul.f32 %v1260_v12, %v505_v63  ;;  %vm1350_vm5 = vcmp.lt.f32.partialorder %v353_v40, 0.0004427343  ;;  %v360_v7 = vadd.f32 1.0, %v359_v15 }
  0x94   : > { %v368_v30 = vmul.f32 -0.5, %v1242_v4  ;;  %v510_v31 = vsub.f32 %v422_v60, %v506_v17  ;;  %v511_v19 = vsub.f32 %v423_v61, %v507_v6  ;;  %v371_v34 = vand.u32 2147483647, %v1242_v4 }
  0x95   : > { %v437_v32 = vmul.f32 -0.5, %v1252_v9  ;;  %v512_v8 = vsub.f32 %v424_v16, %v508_v26  ;;  %v513_v36 = vsub.f32 %v425_v5, %v509_v27  ;;  %v343_v42 = vmul.f32 %v1236_v1, %v342_v52  ;;  %v889_v1 = vpop.eup %888 }
  0x96   : > { %v446_v43 = vmul.f32 -0.5, %v1254_v10  ;;  %v514_v40 = vmax.f32 %v510_v31, 1e-12  ;;  %v515_v44 = vmax.f32 %v511_v19, 1e-12  ;;  %v352_v45 = vmul.f32 %v1238_v2, %v351_v24  ;;  %v891_v5 = vpop.eup %890 }
  0x97   : > { %v455_v46 = vmul.f32 -0.5, %v1257_v11  ;;  %v516_v47 = vmax.f32 %v512_v8, 1e-12  ;;  %v517_v48 = vmax.f32 %v513_v36, 1e-12  ;;  %v369_v55 = vadd.f32 1.0, %v368_v30 }
  0x98   : > { %vm1361_vm6 = vcmp.lt.f32.partialorder %v362_v25, 0.0004427343  ;;  %v464_v15 = vmul.f32 -0.5, %v1260_v12  ;;  %894 = vlog2.f32 %v514_v40  ;;  %v361_v52 = vmul.f32 %v1240_v3, %v360_v7  ;;  %v893_v25 = vpop.eup %892 }
  0x99   : > { %vm1367_vm7 = vcmp.lt.f32.partialorder %v371_v34, 0.0004427343  ;;  %v438_v2 = vadd.f32 1.0, %v437_v32  ;;  %896 = vlog2.f32 %v515_v44  ;;  %v340_v58 = vmul.f32 0.6931472, %v879_v59 }
  0x9a   : > { %v440_v60 = vand.u32 2147483647, %v1252_v9  ;;  %v447_v61 = vadd.f32 1.0, %v446_v43  ;;  %898 = vlog2.f32 %v516_v47  ;;  %v349_v62 = vmul.f32 0.6931472, %v881_v0 }
  0x9b   : > { %v449_v63 = vand.u32 2147483647, %v1254_v10  ;;  %v456_v16 = vadd.f32 1.0, %v455_v46  ;;  %900 = vlog2.f32 %v517_v48  ;;  %v358_v17 = vmul.f32 0.6931472, %v883_v28 }
  0x9c   : > { %v370_v3 = vmul.f32 %v1242_v4, %v369_v55  ;;  %v458_v6 = vand.u32 2147483647, %v1257_v11  ;;  %v465_v24 = vadd.f32 1.0, %v464_v15  ;;  %v367_v26 = vmul.f32 0.6931472, %v885_v33 }
  0x9d   : > { %v436_v27 = vmul.f32 0.6931472, %v887_v50  ;;  %v439_v59 = vmul.f32 %v1252_v9, %v438_v2  ;;  %v467_v7 = vand.u32 2147483647, %v1260_v12  ;;  %v346_v0 = vsel %vm1343_vm4, %v343_v42, %v340_v58 }
  0x9e   : > { %vm1379_vm8 = vcmp.lt.f32.partialorder %v440_v60, 0.0004427343  ;;  %v445_v28 = vmul.f32 0.6931472, %v889_v1  ;;  %v448_v4 = vmul.f32 %v1254_v10, %v447_v61  ;;  %v355_v31 = vsel %vm1350_vm5, %v352_v45, %v349_v62 }
  0x9f   : > { %vm1386_vm9 = vcmp.lt.f32.partialorder %v449_v63, 0.0004427343  ;;  %v454_v9 = vmul.f32 0.6931472, %v891_v5  ;;  %v457_v33 = vmul.f32 %v1257_v11, %v456_v16  ;;  %v364_v23 = vsel %vm1361_vm6, %v361_v52, %v358_v17 }
  0xa0   : > { %vm1393_vm10 = vcmp.lt.f32.partialorder %v458_v6, 0.0004427343  ;;  %v463_v32 = vmul.f32 0.6931472, %v893_v25  ;;  %v466_v10 = vmul.f32 %v1260_v12, %v465_v24  ;;  %v373_v29 = vsel %vm1367_vm7, %v370_v3, %v367_v26 }
  0xa1   : > { %v374_v8 = vadd.f32 %v346_v0, %v334_v49  ;;  %v442_v36 = vsel %vm1379_vm8, %v439_v59, %v436_v27  ;;  %vm1404_vm11 = vcmp.lt.f32.partialorder %v467_v7, 0.0004427343  ;;  %v375_v42 = vadd.f32 %v355_v31, %v335_v53 }
  0xa2   : > { %v451_v43 = vsel %vm1386_vm9, %v448_v4, %v445_v28  ;;  %v567_v12 = vsub.f32 %v1282_v20, %v1296_v38  ;;  %v376_v49 = vadd.f32 %v364_v23, %v336_v54  ;;  %v460_v40 = vsel %vm1393_vm10, %v457_v33, %v454_v9 }
  0xa3   : > { %v377_v44 = vadd.f32 %v373_v29, %v337_v57  ;;  %v469_v53 = vsel %vm1404_vm11, %v466_v10, %v463_v32  ;;  %v470_v45 = vsub.f32 0.0, %v442_v36  ;;  %v568_v46 = vsub.f32 %v1285_v21, %v1296_v38 }
  0xa4   : > { %v378_v48 = vsub.f32 %v1224_v35, %v374_v8  ;;  %v471_v50 = vsub.f32 0.0, %v451_v43  ;;  %v570_v54 = vmul.f32 1.442695, %v566_v51  ;;  %v379_v57 = vsub.f32 %v1226_v37, %v375_v42 }
  0xa5   : > { %v895_v47 = vpop.eup %894  ;;  %v472_v55 = vsub.f32 0.0, %v460_v40  ;;  %v572_v1 = vmul.f32 1.442695, %v567_v12  ;;  %v380_v56 = vsub.f32 %v1228_v39, %v376_v49  ;;  %v473_v2 = vsub.f32 0.0, %v469_v53 }
  0xa6   : > { %v897_v13 = vpop.eup %896  ;;  %v519_v15 = vmul.f32 0.6931472, %v895_v47  ;;  %v569_v60 = vsub.f32 %v1288_v22, %v1296_v38  ;;  %v381_v61 = vsub.f32 %v1231_v41, %v377_v44  ;;  %v574_v63 = vmul.f32 1.442695, %v568_v46 }
  0xa7   : > { %v899_v52 = vpop.eup %898  ;;  %v521_v58 = vmul.f32 0.6931472, %v897_v13  ;;  %902 = vpow2.f32 %v570_v54 }
  0xa8   : > { %v901_v35 = vpop.eup %900  ;;  %v523_v62 = vmul.f32 0.6931472, %v899_v52  ;;  %v528_v51 = vsel %vm262_vm12, %v470_v45, %v519_v15  ;;  %904 = vpow2.f32 %v572_v1  ;;  %v576_v7 = vmul.f32 1.442695, %v569_v60 }
  0xa9   : > { %v525_v37 = vmul.f32 0.6931472, %v901_v35  ;;  %v529_v16 = vsel %vm262_vm12, %v471_v50, %v521_v58  ;;  %v534_v39 = vsel %vm263_vm13, %v378_v48, %v528_v51  ;;  %906 = vpow2.f32 %v574_v63 }
  0xaa   : > { %v530_v5 = vsel %vm262_vm12, %v472_v55, %v523_v62  ;;  %v535_v17 = vsel %vm263_vm13, %v379_v57, %v529_v16  ;;  %v538_v41 = vadd.f32 %v534_v39, %v1279_v18  ;;  %908 = vpow2.f32 %v576_v7 }
  0xab   : > { %v531_v3 = vsel %vm262_vm12, %v473_v2, %v525_v37  ;;  %v536_v6 = vsel %vm263_vm13, %v380_v56, %v530_v5  ;;  %v539_v24 = vadd.f32 %v535_v17, %v1282_v20 }
  0xac   : > { %v537_v25 = vsel %vm263_vm13, %v381_v61, %v531_v3  ;;  %v540_v26 = vadd.f32 %v536_v6, %v1285_v21 }
  0xad   : > { %v541_v27 = vadd.f32 %v537_v25, %v1288_v22  ;;  %v542_v59 = vmax.f32 %v538_v41, %v539_v24 }
  0xaf   : > { %v543_v18 = vmax.f32 %v540_v26, %v541_v27 }
  0xb1   : > { %v544_v0 = vmax.f32 %v542_v59, %v543_v18 }
  0xb3   : > { %v545_v30 = vsub.f32 %v538_v41, %v544_v0  ;;  %v546_v28 = vsub.f32 %v539_v24, %v544_v0  ;;  %v547_v4 = vsub.f32 %v540_v26, %v544_v0  ;;  %v548_v31 = vsub.f32 %v541_v27, %v544_v0 }
  0xb4   : > { %v903_v33 = vpop.eup %902 }
  0xb5   : > { %v549_v19 = vmul.f32 1.442695, %v545_v30  ;;  %v551_v9 = vmul.f32 1.442695, %v546_v28  ;;  %v553_v20 = vmul.f32 1.442695, %v547_v4  ;;  %v905_v23 = vpop.eup %904 }
  0xb6   : > { %v555_v14 = vmul.f32 1.442695, %v548_v31  ;;  %v578_v21 = vadd.f32 %v905_v23, %v903_v33  ;;  %v907_v22 = vpop.eup %906 }
  0xb7   : > { %910 = vpow2.f32 %v549_v19  ;;  %v909_v32 = vpop.eup %908 }
  0xb8   : > { %912 = vpow2.f32 %v551_v9  ;;  %v579_v34 = vadd.f32 %v907_v22, %v578_v21 }
  0xb9   : > { %914 = vpow2.f32 %v553_v20 }
  0xba   : > { %916 = vpow2.f32 %v555_v14  ;;  %v580_v10 = vadd.f32 %v909_v32, %v579_v34 }
  0xbc   : > { %918 = vlog2.f32 %v580_v10 }
  0xc4   : > { %v911_v29 = vpop.eup %910 }
  0xc5   : > { %v913_v8 = vpop.eup %912 }
  0xc6   : > { %v915_v36 = vpop.eup %914  ;;  %v557_v11 = vadd.f32 %v913_v8, %v911_v29 }
  0xc7   : > { %v917_v42 = vpop.eup %916 }
  0xc8   : > { %v558_v43 = vadd.f32 %v915_v36, %v557_v11 }
  0xc9   : > { %v919_v49 = vpop.eup %918 }
  0xca   : > { %v559_v12 = vadd.f32 %v917_v42, %v558_v43  ;;  %v582_v40 = vmul.f32 0.6931472, %v919_v49 }
  0xcc   : > { %920 = vlog2.f32 %v559_v12  ;;  %v583_v45 = vadd.f32 %v582_v40, %v1296_v38 }
  0xd9   : > { %v921_v44 = vpop.eup %920 }
  0xda   : > { %v561_v53 = vmul.f32 0.6931472, %v921_v44 }
  0xdc   : > { %v562_v46 = vadd.f32 %v561_v53, %v544_v0 }
  0xde   : > { %v584_v47 = vsub.f32 %v583_v45, %v562_v46 }
  0xe0   : > { %585 = vst [vmem:[%s260_s3] sm:$0xff] %v584_v47 }
  0xe1   : > { %961 = shalt.err (!%p958_p5)
}
  0xe2   : > { %s962_s17 = scalar_lea.hbm %s601_s19, 128  ;;  %s966_s22 = scalar_lea.hbm %s1506_s2, 1024 }
  0xe3   : > { %p963_p6 = scmp.ne.s32.totalorder %s601_s19, %s962_s17  ;;  %p967_p11 = scmp.lt.s32.totalorder %s601_s19, %s1506_s2 }
  0xe4   : > { %p968_p13 = scmp.lt.s32.totalorder %s966_s22, %s962_s17 }
  0xe5   : > { %p964_p7 = pnand %p963_p6, %p1137_p9 }
  0xe6   : > { %p969_p3 = por %p968_p13, %p967_p11 }
  0xe7   : > { %p965_p10 = pneg %p964_p7 }
  0xe9   : > { %p970_p8 = pnand %p969_p3, %p965_p10 }
  0xeb   : > { %973 = shalt.err (!%p970_p8)
}
  0xec   : > { %761 = dma.vmem_to_hbm [thread:$0]  (%p1137_p9), %s604_s4, 128, %s601_s19, %s587_s13  }
  0xed PF: > { %p767_p0 = scmp.ge.s32.totalorder %s1048_s16, 2  ;;  %s615_s23 = sand.u32 1, %s1020_s9  }
  0xee   : > { %s616_s26 = scalar_lea.sflag [#allocation4], %s615_s23 }
  0xef   : > { %p764_p1 = pnand %p767_p0, %p1144_p12 }
  0xf1   : > { %p765_p2 = pneg %p764_p1 }
  0xf3   : > { %1015 = dma.done.wait (%p765_p2), %s616_s26, 128  }
  0xf4   : > { %1017 = vsyncadd (%p765_p2), %s616_s26, 4294967168  ;;  %s21_s16 = sadd.s32 1, %s1048_s16   ;;  %s1531_s24 = sld [smem:[#allocation14_spill]] }
  0xf5   : > { %p18_p4 = scmp.ge.s32.totalorder %s21_s16, 10   ;;  %s1532_s27 = sld [smem:[#allocation15_spill]] }
  0xf6   : > { %s1533_s9 = smov %s1024_s10  ;;  %s1534_s10 = smov %s1028_s11 }
  0xf7   : > { %s1535_s11 = smov %s1149_s29  ;;  %s1536_s12 = smov %s1040_s14 }
  0xf8   : > { %s1537_s13 = smov %s1044_s15  ;;  %20 = sbr.rel (!%p18_p4) target bundleno = 9 (0x9), region = 93 }
  0xfa   : > { %s1538_s14 = smov %s1531_s24 }
  0xfb   : > { %s1539_s15 = smov %s1532_s27 }
  0xfd   :  { %621 = vsyncpa [#allocation3], 1 }
  0xfe   :  { %623 = vsyncpa [#allocation3 + $0x1], 1 }
  0xff   :  { %624 = vsyncpa [#allocation6], 1 }
 0x100   :  { %626 = vsyncpa [#allocation6 + $0x1], 1 }
 0x101   :  { %627 = vsyncpa [#allocation4], 1 }
 0x102   :  { %629 = vsyncpa [#allocation4 + $0x1], 1 }

</bundles_post_ra>
